<compile_context>
chip_gen: v5e
topology: v5e:2x2
jax: 0.10.0
libtpu: 0.0.40
codegen_flags: <defaults>
</compile_context>

<pallas_src>
import functools
import math

import jax
import jax.numpy as jnp
from jax import lax
from jax.experimental import pallas as pl
from jax.experimental.pallas import tpu as pltpu


# ---------------------------------------------------------------------------
# Kernel body (static configuration bound via functools.partial)
# ---------------------------------------------------------------------------

def _attn_kernel(*refs, masked: bool, emit_scores: bool, mxu_bf16: bool):
    q_ref, k_ref, v_ref = refs[0], refs[1], refs[2]
    mask_ref = refs[3] if masked else None
    n_in = 4 if masked else 3
    o_ref = refs[n_in]
    s_ref = refs[n_in + 1] if emit_scores else None

    q = q_ref[0, 0]          # (TQ, D), native dtype (bf16 stays bf16)
    k = k_ref[0, 0]          # (S,  D)
    v = v_ref[0, 0]          # (S,  D)
    d = k.shape[-1]

    # Optional fast path: bf16 MXU operands for f32 inputs (3-6x MXU speedup
    # on every generation); accumulation stays f32.
    if mxu_bf16 and q.dtype == jnp.float32:
        q = q.astype(jnp.bfloat16)
        k = k.astype(jnp.bfloat16)

    # QK^T: contract on D of both operands (no explicit transpose of k).
    scores = lax.dot_general(
        q, k, (((1,), (1,)), ((), ())), preferred_element_type=jnp.float32)
    scores = scores * jnp.float32(1.0 / math.sqrt(d))

    if masked:
        mask = mask_ref[0, 0]            # (TQ or 1, S or 1); broadcasts
        # Exact masked_fill semantics (not an additive bias), keeps the
        # degenerate fully-masked-row behavior identical to torch.
        scores = jnp.where(mask == 0, jnp.float32(-10000000000.0), scores)

    # Numerically stable softmax in f32 (VPU/EUP math stays f32 -> v5e safe).
    m = jnp.max(scores, axis=-1, keepdims=True)
    e = jnp.exp(scores - m)
    denom = jnp.sum(e, axis=-1, keepdims=True)
    p = e * pl.reciprocal(denom, approx=False)   # exact: keeps 1e-5 accuracy

    if emit_scores:
        s_ref[0, 0] = p.astype(s_ref.dtype)

    if mxu_bf16 and v.dtype == jnp.float32:
        pv, vv = p.astype(jnp.bfloat16), v.astype(jnp.bfloat16)
    else:
        pv, vv = p.astype(v.dtype), v
    o_ref[0, 0] = jnp.dot(
        pv, vv, preferred_element_type=jnp.float32).astype(o_ref.dtype)


# ---------------------------------------------------------------------------
# Generation-aware tile-size / VMEM budgeting
# ---------------------------------------------------------------------------

def _vmem_capacity_bytes():
    """Per-TensorCore VMEM capacity; falls back to the smallest (v7x: 64 MiB)."""
    try:
        info = pltpu.get_tpu_info()
        cap = int(getattr(info, "vmem_capacity_bytes", 0) or 0)
        if cap > 0:
            return cap
    except Exception:
        pass
    return 64 << 20


def _vmem_estimate(S, D, tq, in_isz, out_isz, mask_isz, emit_scores, kv_buffers):
    """Rough per-step VMEM bytes: pipeline blocks + in-kernel f32 temps."""
    b = 2 * kv_buffers * S * D * in_isz      # resident k and v blocks
    b += 2 * tq * D * in_isz                 # q tile (double-buffered)
    b += 2 * tq * D * out_isz                # out tile (double-buffered)
    if emit_scores:
        b += 2 * tq * S * out_isz            # scores out tile
    if mask_isz:
        b += 2 * tq * S * mask_isz           # mask tile
    b += 3 * tq * S * 4                      # f32 temporaries (scores/e/p)
    return b


def _choose_q_tile(S, D, in_isz, out_isz, mask_isz, emit_scores, budget):
    if S <= 8:
        return S
    # Largest candidate that fits the budget; prefer tiles that divide S evenly.
    cands = [S] + [c for c in (1024, 512, 256, 128, 64, 32, 16, 8) if c < S]
    fallback = None
    for c in cands:
        if _vmem_estimate(S, D, c, in_isz, out_isz, mask_isz, emit_scores,
                          kv_buffers=1) <= budget:
            if S % c == 0:
                return c
            if fallback is None:
                fallback = c
    return fallback if fallback is not None else 8


# ---------------------------------------------------------------------------
# Wrapper (equivalent of Attention.forward(q, k, v, mask, dropout=None))
# ---------------------------------------------------------------------------

def attention(q, k, v, mask=None, *, return_scores=True, mxu_bf16=False):
    """q, k, v: [B, H, S, D]. Returns (out [B,H,S,D], scores [B,H,S,S] or None)."""
    # TODO(synk): dropout argument (a torch module applied to the probabilities)
    # is not implemented; forward is reproduced for dropout=None (eval) semantics.
    B, H, S, D = q.shape
    in_isz = jnp.dtype(q.dtype).itemsize
    out_isz = in_isz

    masked = mask is not None
    if masked:
        # Keep the mask at its natural (broadcastable) shape; broadcast dims are
        # handled by the index_map instead of materializing (B, H, S, S) in HBM.
        m = jnp.asarray(mask)
        if m.dtype == jnp.bool_:
            m = m.astype(jnp.int8)
        if m.ndim > 4:
            raise ValueError("mask rank must be <= 4")
        m = m.reshape((1,) * (4 - m.ndim) + m.shape)
        Bm, Hm, Sq_m, Sk_m = m.shape
        if (Bm not in (1, B) or Hm not in (1, H)
                or Sq_m not in (1, S) or Sk_m not in (1, S)):
            raise ValueError(f"mask shape {m.shape} not broadcastable to {(B, H, S, S)}")
        mask_isz = jnp.dtype(m.dtype).itemsize
    else:
        mask_isz = 0

    # Generation-aware budget: ~45% of per-core VMEM for the live tile set
    # (v5e/v6e: ~57 MiB of 128 MiB; v7x: ~28 MiB of 64 MiB).
    cap = _vmem_capacity_bytes()
    budget = int(cap * 0.45)
    TQ = _choose_q_tile(S, D, in_isz, out_isz, mask_isz, return_scores, budget)
    n_q = pl.cdiv(S, TQ)
    grid = (B, H, n_q)

    q_spec = pl.BlockSpec((1, 1, TQ, D), lambda b, h, qt: (b, h, qt, 0))
    o_spec = pl.BlockSpec((1, 1, TQ, D), lambda b, h, qt: (b, h, qt, 0))
    if return_scores:
        out_specs = (o_spec,
                     pl.BlockSpec((1, 1, TQ, S), lambda b, h, qt: (b, h, qt, 0)))
        out_shape = (jax.ShapeDtypeStruct((B, H, S, D), q.dtype),
                     jax.ShapeDtypeStruct((B, H, S, S), q.dtype))
    else:
        out_specs = o_spec
        out_shape = jax.ShapeDtypeStruct((B, H, S, D), q.dtype)

    if masked:
        mq_blk = 1 if Sq_m == 1 else TQ

        def mask_idx(b, h, qt):
            return (b if Bm != 1 else 0, h if Hm != 1 else 0,
                    qt if Sq_m != 1 else 0, 0)

        mask_spec = pl.BlockSpec((1, 1, mq_blk, Sk_m), mask_idx)

    # vmem_limit clamped below the physical per-core VMEM (critical on v7x:
    # never request more than ~54 MiB there; ~108 MiB ceiling on v5e/v6e).
    est = _vmem_estimate(S, D, TQ, in_isz, out_isz, mask_isz, return_scores,
                         kv_buffers=2)
    ceiling = int(cap * 0.85)
    vmem_limit = max(min(est + (8 << 20), ceiling), min(32 << 20, ceiling))

    cp = pltpu.CompilerParams(
        # Megacore shards the parallel B/H axes across TensorCores; the inner
        # q-tile axis stays "arbitrary" so both cores never DMA the same k/v.
        dimension_semantics=("parallel", "parallel", "arbitrary"),
        vmem_limit_bytes=vmem_limit,
    )

    kernel_fn = functools.partial(_attn_kernel, masked=masked,
                                  emit_scores=return_scores, mxu_bf16=mxu_bf16)
    args = (q, k, v, m) if masked else (q, k, v)

    def _call(kv_pipeline_mode):
        kv_kwargs = {} if kv_pipeline_mode is None else {
            "pipeline_mode": kv_pipeline_mode}
        # k/v block index is constant along the q-tile axis -> stays resident.
        kv_spec = pl.BlockSpec((1, 1, S, D), lambda b, h, qt: (b, h, 0, 0),
                               **kv_kwargs)
        in_specs = [q_spec, kv_spec, kv_spec] + ([mask_spec] if masked else [])
        return pl.pallas_call(
            kernel_fn,
            out_shape=out_shape,
            grid=grid,
            in_specs=in_specs,
            out_specs=out_specs,
            compiler_params=cp,
        )(*args)

    try:
        # Single-buffer the resident k/v: the 2nd pipeline buffer buys no
        # overlap for a constant block index but costs 2*S*D*itemsize of VMEM.
        results = _call(pl.Buffered(1))
    except Exception:
        # TODO(synk): drop this fallback once single-buffered pipeline_mode is
        # guaranteed available; double-buffered k/v remains fully correct.
        results = _call(None)

    if return_scores:
        out, scores = results
        return out, scores
    return results, None


# ---------------------------------------------------------------------------
# Reference + test
# ---------------------------------------------------------------------------

def _reference(q, k, v, mask=None):
    d = q.shape[-1]
    scores = jnp.einsum("bhqd,bhkd->bhqk", q, k) / math.sqrt(d)
    if mask is not None:
        scores = jnp.where(mask == 0, -10000000000.0, scores)
    scores = jax.nn.softmax(scores, axis=-1)
    return jnp.einsum("bhqk,bhkd->bhqd", scores, v), scores


if __name__ == "__main__":
    B, H, S, D = 2, 2, 8, 32
    key = jax.random.PRNGKey(0)
    kq, kk, kv_ = jax.random.split(key, 3)
    q = jax.random.normal(kq, (B, H, S, D), dtype=jnp.float32)
    k = jax.random.normal(kk, (B, H, S, D), dtype=jnp.float32)
    v = jax.random.normal(kv_, (B, H, S, D), dtype=jnp.float32)

    # 1) Unmasked path.
    out, scores = jax.block_until_ready(attention(q, k, v))
    ref_out, ref_scores = _reference(q, k, v)
    assert jnp.allclose(out, ref_out, atol=1e-5, rtol=1e-5)
    assert jnp.allclose(scores, ref_scores, atol=1e-5, rtol=1e-5)

    # 2) Masked path (broadcastable int8 causal mask; never materialized BHSS).
    causal = jnp.tril(jnp.ones((S, S), dtype=jnp.int8))[None, None]  # (1,1,S,S)
    out_m, scores_m = jax.block_until_ready(attention(q, k, v, mask=causal))
    ref_out_m, ref_scores_m = _reference(q, k, v, mask=causal)
    assert jnp.allclose(out_m, ref_out_m, atol=1e-5, rtol=1e-5)
    assert jnp.allclose(scores_m, ref_scores_m, atol=1e-5, rtol=1e-5)

    # 3) Scores-free variant (skips the O(S^2) writeback entirely).
    out_ns, _ = jax.block_until_ready(attention(q, k, v, return_scores=False))
    assert jnp.allclose(out_ns, ref_out, atol=1e-5, rtol=1e-5)

    # 4) Fast-MXU variant (bf16 operands, f32 accumulation) -> looser tolerance.
    out_fast, _ = jax.block_until_ready(attention(q, k, v, mxu_bf16=True))
    assert jnp.allclose(out_fast, ref_out, atol=5e-2, rtol=5e-2)

    print("KERNEL_OK")
</pallas_src>

<mosaic_0001>
module attributes {stable_mosaic.version = 11 : i64} {
  func.func @_attn_kernel(%arg0: i32, %arg1: i32, %arg2: i32, %arg3: memref<1x1x8x32xf32, #tpu.memory_space<vmem>>, %arg4: memref<1x1x8x32xf32, #tpu.memory_space<vmem>>, %arg5: memref<1x1x8x32xf32, #tpu.memory_space<vmem>>, %arg6: memref<1x1x8x32xf32, #tpu.memory_space<vmem>>, %arg7: memref<1x1x8x8xf32, #tpu.memory_space<vmem>>) attributes {dimension_semantics = [#tpu.dimension_semantics<parallel>, #tpu.dimension_semantics<parallel>, #tpu.dimension_semantics<arbitrary>], iteration_bounds = array<i64: 2, 2, 1>, scalar_prefetch = 0 : i64, scratch_operands = 0 : i64, tpu.core_type = #tpu.core_type<tc>, window_params = [{transform_indices = @transform_0, window_bounds = array<i64: 1, 1, 8, 32>}, {pipeline_mode = #tpu.pipeline_mode<synchronous>, transform_indices = @transform_1, window_bounds = array<i64: 1, 1, 8, 32>}, {pipeline_mode = #tpu.pipeline_mode<synchronous>, transform_indices = @transform_2, window_bounds = array<i64: 1, 1, 8, 32>}, {transform_indices = @transform_3, window_bounds = array<i64: 1, 1, 8, 32>}, {transform_indices = @transform_4, window_bounds = array<i64: 1, 1, 8, 8>}]} {
    %c0 = arith.constant 0 : index
    %c0_0 = arith.constant 0 : index
    %c0_1 = arith.constant 0 : index
    %c0_2 = arith.constant 0 : index
    %0 = vector.load %arg3[%c0, %c0_0, %c0_1, %c0_2] : memref<1x1x8x32xf32, #tpu.memory_space<vmem>>, vector<1x1x8x32xf32>
    %1 = vector.shape_cast %0 : vector<1x1x8x32xf32> to vector<8x32xf32>
    %c0_3 = arith.constant 0 : index
    %c0_4 = arith.constant 0 : index
    %c0_5 = arith.constant 0 : index
    %c0_6 = arith.constant 0 : index
    %2 = vector.load %arg4[%c0_3, %c0_4, %c0_5, %c0_6] : memref<1x1x8x32xf32, #tpu.memory_space<vmem>>, vector<1x1x8x32xf32>
    %3 = vector.shape_cast %2 : vector<1x1x8x32xf32> to vector<8x32xf32>
    %c0_7 = arith.constant 0 : index
    %c0_8 = arith.constant 0 : index
    %c0_9 = arith.constant 0 : index
    %c0_10 = arith.constant 0 : index
    %4 = vector.load %arg5[%c0_7, %c0_8, %c0_9, %c0_10] : memref<1x1x8x32xf32, #tpu.memory_space<vmem>>, vector<1x1x8x32xf32>
    %5 = vector.shape_cast %4 : vector<1x1x8x32xf32> to vector<8x32xf32>
    %cst = arith.constant dense<0.000000e+00> : vector<8x8xf32>
    %6 = tpu.matmul %1, %3, %cst {dimension_numbers = #tpu.dot_dimension_numbers<[1], [1], [0], [0], [0, 0, 1, 0], [], []>} : vector<8x32xf32>, vector<8x32xf32>, vector<8x8xf32> -> vector<8x8xf32>
    %cst_11 = arith.constant 0.176776692 : f32
    %7 = vector.broadcast %cst_11 : f32 to vector<8x8xf32>
    %8 = arith.mulf %6, %7 : vector<8x8xf32>
    %cst_12 = arith.constant dense<0xFF800000> : vector<8xf32>
    %9 = vector.multi_reduction <maximumf>, %8, %cst_12 [1] : vector<8x8xf32> to vector<8xf32>
    %10 = vector.shape_cast %9 : vector<8xf32> to vector<8x1xf32>
    %11 = vector.broadcast %10 : vector<8x1xf32> to vector<8x8xf32>
    %12 = arith.subf %8, %11 : vector<8x8xf32>
    %13 = math.exp %12 : vector<8x8xf32>
    %cst_13 = arith.constant dense<0.000000e+00> : vector<8xf32>
    %14 = vector.multi_reduction <add>, %13, %cst_13 [1] : vector<8x8xf32> to vector<8xf32>
    %15 = vector.shape_cast %14 : vector<8xf32> to vector<8x1xf32>
    %16 = tpu.reciprocal %15 : vector<8x1xf32> -> vector<8x1xf32>
    %17 = vector.broadcast %16 : vector<8x1xf32> to vector<8x8xf32>
    %18 = arith.mulf %13, %17 : vector<8x8xf32>
    %c0_14 = arith.constant 0 : index
    %c0_15 = arith.constant 0 : index
    %c0_16 = arith.constant 0 : index
    %c0_17 = arith.constant 0 : index
    %19 = vector.load %arg7[%c0_14, %c0_15, %c0_16, %c0_17] : memref<1x1x8x8xf32, #tpu.memory_space<vmem>>, vector<1x1x8x8xf32>
    %20 = vector.shape_cast %19 : vector<1x1x8x8xf32> to vector<8x8xf32>
    %21 = vector.shape_cast %18 : vector<8x8xf32> to vector<1x1x8x8xf32>
    tpu.vector_store %arg7[%c0_14, %c0_15, %c0_16, %c0_17], %21 {strides = array<i32>} : memref<1x1x8x8xf32, #tpu.memory_space<vmem>>, vector<1x1x8x8xf32>,
    %cst_18 = arith.constant dense<0.000000e+00> : vector<8x32xf32>
    %22 = tpu.matmul %18, %5, %cst_18 {dimension_numbers = #tpu.dot_dimension_numbers<[1], [0], [0], [1], [0, 0, 1, 1], [], []>} : vector<8x8xf32>, vector<8x32xf32>, vector<8x32xf32> -> vector<8x32xf32>
    %c0_19 = arith.constant 0 : index
    %c0_20 = arith.constant 0 : index
    %c0_21 = arith.constant 0 : index
    %c0_22 = arith.constant 0 : index
    %23 = vector.load %arg6[%c0_19, %c0_20, %c0_21, %c0_22] : memref<1x1x8x32xf32, #tpu.memory_space<vmem>>, vector<1x1x8x32xf32>
    %24 = vector.shape_cast %23 : vector<1x1x8x32xf32> to vector<8x32xf32>
    %25 = vector.shape_cast %22 : vector<8x32xf32> to vector<1x1x8x32xf32>
    tpu.vector_store %arg6[%c0_19, %c0_20, %c0_21, %c0_22], %25 {strides = array<i32>} : memref<1x1x8x32xf32, #tpu.memory_space<vmem>>, vector<1x1x8x32xf32>,
    return
  }
  func.func @transform_0(%arg0: i32, %arg1: i32, %arg2: i32) -> (i32, i32, i32, i32) {
    %c0_i32 = arith.constant 0 : i32
    %c0_i32_0 = arith.constant 0 : i32
    return %arg0, %arg1, %arg2, %c0_i32 : i32, i32, i32, i32
  }
  func.func @transform_1(%arg0: i32, %arg1: i32, %arg2: i32) -> (i32, i32, i32, i32) {
    %c0_i32 = arith.constant 0 : i32
    %c0_i32_0 = arith.constant 0 : i32
    %c0_i32_1 = arith.constant 0 : i32
    return %arg0, %arg1, %c0_i32, %c0_i32_0 : i32, i32, i32, i32
  }
  func.func @transform_2(%arg0: i32, %arg1: i32, %arg2: i32) -> (i32, i32, i32, i32) {
    %c0_i32 = arith.constant 0 : i32
    %c0_i32_0 = arith.constant 0 : i32
    %c0_i32_1 = arith.constant 0 : i32
    return %arg0, %arg1, %c0_i32, %c0_i32_0 : i32, i32, i32, i32
  }
  func.func @transform_3(%arg0: i32, %arg1: i32, %arg2: i32) -> (i32, i32, i32, i32) {
    %c0_i32 = arith.constant 0 : i32
    %c0_i32_0 = arith.constant 0 : i32
    return %arg0, %arg1, %arg2, %c0_i32 : i32, i32, i32, i32
  }
  func.func @transform_4(%arg0: i32, %arg1: i32, %arg2: i32) -> (i32, i32, i32, i32) {
    %c0_i32 = arith.constant 0 : i32
    %c0_i32_0 = arith.constant 0 : i32
    return %arg0, %arg1, %arg2, %c0_i32 : i32, i32, i32, i32
  }
}

module attributes {stable_mosaic.version = 11 : i64} {
  func.func @_attn_kernel(%arg0: i32, %arg1: i32, %arg2: i32, %arg3: memref<1x1x8x32xf32, #tpu.memory_space<vmem>>, %arg4: memref<1x1x8x32xf32, #tpu.memory_space<vmem>>, %arg5: memref<1x1x8x32xf32, #tpu.memory_space<vmem>>, %arg6: memref<1x1x8x32xf32, #tpu.memory_space<vmem>>, %arg7: memref<1x1x8x8xf32, #tpu.memory_space<vmem>>) attributes {dimension_semantics = [#tpu.dimension_semantics<parallel>, #tpu.dimension_semantics<parallel>, #tpu.dimension_semantics<arbitrary>], iteration_bounds = array<i64: 2, 2, 1>, scalar_prefetch = 0 : i64, scratch_operands = 0 : i64, tpu.core_type = #tpu.core_type<tc>, window_params = [{transform_indices = @transform_0, window_bounds = array<i64: 1, 1, 8, 32>}, {transform_indices = @transform_1, window_bounds = array<i64: 1, 1, 8, 32>}, {transform_indices = @transform_2, window_bounds = array<i64: 1, 1, 8, 32>}, {transform_indices = @transform_3, window_bounds = array<i64: 1, 1, 8, 32>}, {transform_indices = @transform_4, window_bounds = array<i64: 1, 1, 8, 8>}]} {
    %c0 = arith.constant 0 : index
    %c0_0 = arith.constant 0 : index
    %c0_1 = arith.constant 0 : index
    %c0_2 = arith.constant 0 : index
    %0 = vector.load %arg3[%c0, %c0_0, %c0_1, %c0_2] : memref<1x1x8x32xf32, #tpu.memory_space<vmem>>, vector<1x1x8x32xf32>
    %1 = vector.shape_cast %0 : vector<1x1x8x32xf32> to vector<8x32xf32>
    %c0_3 = arith.constant 0 : index
    %c0_4 = arith.constant 0 : index
    %c0_5 = arith.constant 0 : index
    %c0_6 = arith.constant 0 : index
    %2 = vector.load %arg4[%c0_3, %c0_4, %c0_5, %c0_6] : memref<1x1x8x32xf32, #tpu.memory_space<vmem>>, vector<1x1x8x32xf32>
    %3 = vector.shape_cast %2 : vector<1x1x8x32xf32> to vector<8x32xf32>
    %c0_7 = arith.constant 0 : index
    %c0_8 = arith.constant 0 : index
    %c0_9 = arith.constant 0 : index
    %c0_10 = arith.constant 0 : index
    %4 = vector.load %arg5[%c0_7, %c0_8, %c0_9, %c0_10] : memref<1x1x8x32xf32, #tpu.memory_space<vmem>>, vector<1x1x8x32xf32>
    %5 = vector.shape_cast %4 : vector<1x1x8x32xf32> to vector<8x32xf32>
    %cst = arith.constant dense<0.000000e+00> : vector<8x8xf32>
    %6 = tpu.matmul %1, %3, %cst {dimension_numbers = #tpu.dot_dimension_numbers<[1], [1], [0], [0], [0, 0, 1, 0], [], []>} : vector<8x32xf32>, vector<8x32xf32>, vector<8x8xf32> -> vector<8x8xf32>
    %cst_11 = arith.constant 0.176776692 : f32
    %7 = vector.broadcast %cst_11 : f32 to vector<8x8xf32>
    %8 = arith.mulf %6, %7 : vector<8x8xf32>
    %cst_12 = arith.constant dense<0xFF800000> : vector<8xf32>
    %9 = vector.multi_reduction <maximumf>, %8, %cst_12 [1] : vector<8x8xf32> to vector<8xf32>
    %10 = vector.shape_cast %9 : vector<8xf32> to vector<8x1xf32>
    %11 = vector.broadcast %10 : vector<8x1xf32> to vector<8x8xf32>
    %12 = arith.subf %8, %11 : vector<8x8xf32>
    %13 = math.exp %12 : vector<8x8xf32>
    %cst_13 = arith.constant dense<0.000000e+00> : vector<8xf32>
    %14 = vector.multi_reduction <add>, %13, %cst_13 [1] : vector<8x8xf32> to vector<8xf32>
    %15 = vector.shape_cast %14 : vector<8xf32> to vector<8x1xf32>
    %16 = tpu.reciprocal %15 : vector<8x1xf32> -> vector<8x1xf32>
    %17 = vector.broadcast %16 : vector<8x1xf32> to vector<8x8xf32>
    %18 = arith.mulf %13, %17 : vector<8x8xf32>
    %c0_14 = arith.constant 0 : index
    %c0_15 = arith.constant 0 : index
    %c0_16 = arith.constant 0 : index
    %c0_17 = arith.constant 0 : index
    %19 = vector.load %arg7[%c0_14, %c0_15, %c0_16, %c0_17] : memref<1x1x8x8xf32, #tpu.memory_space<vmem>>, vector<1x1x8x8xf32>
    %20 = vector.shape_cast %19 : vector<1x1x8x8xf32> to vector<8x8xf32>
    %21 = vector.shape_cast %18 : vector<8x8xf32> to vector<1x1x8x8xf32>
    tpu.vector_store %arg7[%c0_14, %c0_15, %c0_16, %c0_17], %21 {strides = array<i32>} : memref<1x1x8x8xf32, #tpu.memory_space<vmem>>, vector<1x1x8x8xf32>,
    %cst_18 = arith.constant dense<0.000000e+00> : vector<8x32xf32>
    %22 = tpu.matmul %18, %5, %cst_18 {dimension_numbers = #tpu.dot_dimension_numbers<[1], [0], [0], [1], [0, 0, 1, 1], [], []>} : vector<8x8xf32>, vector<8x32xf32>, vector<8x32xf32> -> vector<8x32xf32>
    %c0_19 = arith.constant 0 : index
    %c0_20 = arith.constant 0 : index
    %c0_21 = arith.constant 0 : index
    %c0_22 = arith.constant 0 : index
    %23 = vector.load %arg6[%c0_19, %c0_20, %c0_21, %c0_22] : memref<1x1x8x32xf32, #tpu.memory_space<vmem>>, vector<1x1x8x32xf32>
    %24 = vector.shape_cast %23 : vector<1x1x8x32xf32> to vector<8x32xf32>
    %25 = vector.shape_cast %22 : vector<8x32xf32> to vector<1x1x8x32xf32>
    tpu.vector_store %arg6[%c0_19, %c0_20, %c0_21, %c0_22], %25 {strides = array<i32>} : memref<1x1x8x32xf32, #tpu.memory_space<vmem>>, vector<1x1x8x32xf32>,
    return
  }
  func.func @transform_0(%arg0: i32, %arg1: i32, %arg2: i32) -> (i32, i32, i32, i32) {
    %c0_i32 = arith.constant 0 : i32
    %c0_i32_0 = arith.constant 0 : i32
    return %arg0, %arg1, %arg2, %c0_i32 : i32, i32, i32, i32
  }
  func.func @transform_1(%arg0: i32, %arg1: i32, %arg2: i32) -> (i32, i32, i32, i32) {
    %c0_i32 = arith.constant 0 : i32
    %c0_i32_0 = arith.constant 0 : i32
    %c0_i32_1 = arith.constant 0 : i32
    return %arg0, %arg1, %c0_i32, %c0_i32_0 : i32, i32, i32, i32
  }
  func.func @transform_2(%arg0: i32, %arg1: i32, %arg2: i32) -> (i32, i32, i32, i32) {
    %c0_i32 = arith.constant 0 : i32
    %c0_i32_0 = arith.constant 0 : i32
    %c0_i32_1 = arith.constant 0 : i32
    return %arg0, %arg1, %c0_i32, %c0_i32_0 : i32, i32, i32, i32
  }
  func.func @transform_3(%arg0: i32, %arg1: i32, %arg2: i32) -> (i32, i32, i32, i32) {
    %c0_i32 = arith.constant 0 : i32
    %c0_i32_0 = arith.constant 0 : i32
    return %arg0, %arg1, %arg2, %c0_i32 : i32, i32, i32, i32
  }
  func.func @transform_4(%arg0: i32, %arg1: i32, %arg2: i32) -> (i32, i32, i32, i32) {
    %c0_i32 = arith.constant 0 : i32
    %c0_i32_0 = arith.constant 0 : i32
    return %arg0, %arg1, %arg2, %c0_i32 : i32, i32, i32, i32
  }
}

</mosaic_0001>

<bundles_post_ra>
// kernel: tpu_custom_call.1
= control target key start
LH: loop header
LB: loop body
LE: loop exit
PB: predicated region body
PF: predicated region fallthrough
CT: control target
= control target key end

     0   :  { %s1192_s0 = inlined_call_operand.hbm [shape: f32[2,2,8,32], index: 0, kind: input, shape index: {}]   ;;  %s1193_s1 = inlined_call_operand.hbm [shape: f32[2,2,8,32], index: 1, kind: input, shape index: {}]   ;;  %s1194_s2 = inlined_call_operand.hbm [shape: f32[2,2,8,32], index: 2, kind: input, shape index: {}]   ;;  %s1195_s3 = inlined_call_operand.hbm [shape: f32[2,2,8,32], index: 3, kind: output, shape index: {0}]   ;;  %s1196_s4 = inlined_call_operand.hbm [shape: f32[2,2,8,8], index: 4, kind: output, shape index: {1}]  }
   0x1   :  { %1200 = sst [smem:[#allocation18_spill]] %s1193_s1 }
   0x2   :  { %1201 = sst [smem:[#allocation19_spill]] %s1194_s2 }
   0x3   :  { %10 = vsyncpa [#allocation3], 0 }
   0x4   :  { %12 = vsyncpa [#allocation3 + $0x1], 0 }
   0x5   :  { %13 = vsyncpa [#allocation6], 0 }
   0x6   :  { %14 = vsyncpa [#allocation4], 0 }
   0x7   :  { %16 = vsyncpa [#allocation4 + $0x1], 0 }
   0x8   :  { %17 = vsyncpa [#allocation10], 0 }
   0x9   :  { %19 = vsyncpa [#allocation10 + $0x1], 0  ;;  %s965_s15 = smov 0   ;;  %s967_s16 = smov 0  }
   0xa   :  { %s969_s17 = smov 0   ;;  %s971_s18 = smov 0  }
   0xb   :  { %s973_s19 = smov 0   ;;  %s975_s20 = smov 0  }
   0xc   :  { %s977_s21 = smov 0   ;;  %s979_s22 = smov 0  }
   0xd LB: > { %s586_s23 = sadd.s32 4294967295, %s936_s22   ;;  %s587_s24 = sadd.s32 4294967294, %s936_s22   ;;  %s936_s22 = sphi %s979_s22, %s25_s22   ;;  %s932_s21 = sphi %s977_s21, %s1223_s21   ;;  %s928_s20 = sphi %s975_s20, %s1222_s20   ;;  %s924_s19 = sphi %s973_s19, %s1221_s19   ;;  %s920_s18 = sphi %s971_s18, %s1220_s18   ;;  %s916_s17 = sphi %s969_s17, %s1219_s17   ;;  %s912_s16 = sphi %s967_s16, %s1218_s16   ;;  %s908_s15 = sphi %s965_s15, %s1217_s15  }
   0xe   : > { %p68_p0 = scmp.ne.s32.totalorder %s912_s16, %s908_s15  ;;  %p69_p1 = scmp.eq.s32.totalorder %s586_s23, 0 }
   0xf   : > { %p1005_p2 = scmp.eq.s32.totalorder %s586_s23, 3  ;;  %p158_p3 = scmp.eq.s32.totalorder %s587_s24, 3 }
  0x10   : > { %p1009_p4 = por %p69_p1, %p68_p0  ;;  %p588_p5 = scmp.ge.s32.totalorder %s936_s22, 1 }
  0x11   : > { %p1014_p6 = por %p158_p3, %p68_p0  ;;  %p195_p7 = scmp.lt.s32.totalorder %s936_s22, 5 }
  0x12   : > { %s589_s28 = sshll.u32 %s924_s19, 1  ;;  %s938_s6 = smov [#allocation5]  }
  0x13   : > { %s1204_s27 = scalar_select %p1014_p6, 1, 0 }
  0x14   : > { %p1019_p8 = pnand %p588_p5, %p195_p7  ;;  %s207_s30 = sadd.s32 %s920_s18, %s589_s28 }
  0x15   : > { %1205 = sst [smem:[#allocation15_spill]] %s1204_s27  ;;  %s1023_s5 = sshll.u32 %s207_s30, 3 }
  0x16   : > { %s213_s7 = sshll.u32 %s938_s6, 4  ;;  %p622_p9 = pneg %p1019_p8  ;;  %s214_s7 = int_to_ptr.vmem [resolvable:$true] %s213_s7 }
  0x17   : > { %s1207_s1 = sld [smem:[#allocation18_spill]] }
  0x18   : > { %p1033_p10 = pnand %p622_p9, %p1009_p4  ;;  %s1209_s2 = sld [smem:[#allocation19_spill]] }
  0x1a   : > { %p716_p12 = pneg %p1033_p10 }
  0x1d   : > { %s209_s10 = scalar_lea.hbm %s1207_s1, %s1023_s5  ;;  %s719_s6 = scalar_lea.hbm %s1207_s1, 32 }
  0x1e   : > { %s211_s11 = sshll.u32 %s209_s10, 4  ;;  %s225_s18 = scalar_lea.hbm %s1209_s2, %s1023_s5  ;;  %s212_s11 = int_to_ptr.hbm [resolvable:$true] %s211_s11 }
  0x1f   : > { %s1041_s19 = sshll.u32 %s225_s18, 4  ;;  %s712_s23 = sshra.s32 %s212_s11, 4  ;;  %s713_s23 = int_to_ptr.hbm [resolvable:$true] %s712_s23  ;;  %s228_s19 = int_to_ptr.hbm [resolvable:$true] %s1041_s19 }
  0x20   : > { %s714_s24 = scalar_lea.hbm %s713_s23, 8  ;;  %p720_p1 = scmp.lt.s32.totalorder %s713_s23, %s1207_s1 }
  0x21   : > { %p715_p11 = scmp.ne.s32.totalorder %s713_s23, %s714_s24  ;;  %p721_p3 = scmp.lt.s32.totalorder %s719_s6, %s714_s24 }
  0x23   : > { %p717_p13 = pnand %p716_p12, %p715_p11  ;;  %p722_p5 = por %p721_p3, %p720_p1 }
  0x25   : > { %p718_p0 = pneg %p717_p13 }
  0x27   : > { %p723_p7 = pnand %p722_p5, %p718_p0 }
  0x29   : > { %726 = shalt.err (!%p723_p7)
}
  0x2a   : > { %625 = dma.hbm_to_vmem [thread:$0]  (!%p1033_p10), %s212_s11, 128, %s214_s7, [#allocation6]  }
  0x2b   : > { %s939_s10 = smov [#allocation7]   ;;  %s742_s14 = sshra.s32 %s228_s19, 4  ;;  %s743_s14 = int_to_ptr.hbm [resolvable:$true] %s742_s14 }
  0x2c   : > { %s229_s13 = sshll.u32 %s939_s10, 4  ;;  %s744_s18 = scalar_lea.hbm %s743_s14, 8  ;;  %s230_s13 = int_to_ptr.vmem [resolvable:$true] %s229_s13 }
  0x2d   : > { %p745_p9 = scmp.ne.s32.totalorder %s743_s14, %s744_s18  ;;  %s749_s28 = scalar_lea.hbm %s1209_s2, 32 }
  0x2e   : > { %p750_p0 = scmp.lt.s32.totalorder %s743_s14, %s1209_s2  ;;  %p751_p1 = scmp.lt.s32.totalorder %s749_s28, %s744_s18 }
  0x2f   : > { %p747_p11 = pnand %p745_p9, %p716_p12 }
  0x30   : > { %p752_p3 = por %p751_p1, %p750_p0 }
  0x31   : > { %p748_p13 = pneg %p747_p11 }
  0x33   : > { %p753_p5 = pnand %p752_p3, %p748_p13 }
  0x35   : > { %756 = shalt.err (!%p753_p5)
}
  0x36   : > { %628 = dma.hbm_to_vmem [thread:$0]  (!%p1033_p10), %s228_s19, 128, %s230_s13, [#allocation6]  }
  0x37   : > { %s40_s7 = sadd.s32 1, %s928_s20  ;;  %s44_s11 = sadd.s32 1, %s932_s21 }
  0x38   : > { %p42_p12 = scmp.ge.s32.totalorder %s40_s7, 2  ;;  %s55_s8 = sadd.s32 1, %s916_s17 }
  0x39   : > { %p62_p7 = scmp.ne.s32.totalorder %s916_s17, %s912_s16  ;;  %p63_p9 = scmp.eq.s32.totalorder %s936_s22, 0 }
  0x3a   : > { %s1225_s7 = smov (%p42_p12, %s40_s7), 0  ;;  %s1227_s11 = smov (!%p42_p12, %s44_s11), %s932_s21 }
  0x3b   : > { %1210 = sst [smem:[#allocation16_spill]] %s1225_s7  ;;  %s49_s12 = ssub.s32 %s928_s20, %s1225_s7 }
  0x3c   : > { %p1079_p11 = por %p63_p9, %p62_p7  ;;  %p46_p10 = scmp.ge.s32.totalorder %s1227_s11, 2 }
  0x3d   : > { %p1085_p13 = por %p1005_p2, %p62_p7  ;;  %p640_p0 = scmp.lt.s32.totalorder %s936_s22, 4 }
  0x3e   : > { %s240_s10 = sand.u32 1, %s916_s17   ;;  %s1229_s11 = smov (%p46_p10, %s1227_s11), 0 }
  0x3f   : > { %1213 = sst [smem:[#allocation17_spill]] %s1229_s11  ;;  %s594_s13 = sshll.u32 %s240_s10, 3 }
  0x40   : > { %s48_s14 = ssub.s32 %s932_s21, %s1229_s11  ;;  %s595_s23 = sshll.u32 %s932_s21, 1 }
  0x41   : > { %s50_s18 = sor.u32 %s49_s12, %s48_s14  ;;  %s249_s24 = sadd.s32 %s928_s20, %s595_s23 }
  0x42   : > { %p53_p1 = scmp.eq.s32.totalorder %s50_s18, 0  ;;  %s596_s28 = sshll.u32 %s249_s24, 3 }
  0x43   : > { %s244_s30 = scalar_lea.vmem [#allocation2], %s594_s13  ;;  %s251_s7 = scalar_lea.hbm %s1192_s0, %s596_s28 }
  0x44   : > { %s255_s25 = sshll.u32 %s244_s30, 4  ;;  %s253_s27 = sshll.u32 %s251_s7, 4  ;;  %s256_s25 = int_to_ptr.vmem [resolvable:$true] %s255_s25  ;;  %s254_s27 = int_to_ptr.hbm [resolvable:$true] %s253_s27 }
  0x45   : > { %s1098_s6 = scalar_select %p53_p1, %s916_s17, %s55_s8  }
  0x46   : > { %p630_p2 = pnand %p640_p0, %p1079_p11  ;;  %s241_s11 = scalar_lea.sflag [#allocation3], %s240_s10 }
  0x47   : > { %264 = sbr.rel (%p1019_p8) target bundleno = 604 (0x25c), region = 32  ;;  %s1110_s12 = sand.u32 (!%p1019_p8), 1, %s912_s16  }
  0x48   : > { %632 = dma.hbm_to_vmem [thread:$0]  (!%p630_p2), %s254_s27, 128, %s256_s25, %s241_s11  }
  0x49   : > { %s1113_s8 = sshll.u32 (!%p1019_p8), %s1110_s12, 3  ;;  %s267_s1 = scalar_lea.sflag (!%p1019_p8), [#allocation3], %s1110_s12 }
  0x4a   : > { %s270_s2 = scalar_lea.vmem (!%p1019_p8), [#allocation2], %s1113_s8 }
  0x4c   : > { %891 = dma.done.wait (%p1009_p4), %s267_s1, 128  }
  0x4d   : > { %893 = vsyncadd (%p1009_p4), %s267_s1, 4294967168 }
  0x4e   : > { %895 = dma.done.wait (%p1009_p4), [#allocation6], 256  }
  0x4f   : > { %897 = vsyncadd (%p1009_p4), [#allocation6], 4294967040  ;;  %vm314_vm0 = vcmask 261120   ;;  %v312_v0 = vld [vmem:[#allocation5] sm:$0xff]  ;;  %v311_v1 = vld [vmem:[%s270_s2] sm:$0xff]  ;;  %vm342_vm1 = vcmask 64512   ;;  %s428_s29 = scalar_lea.hbm %s1196_s4, %s1023_s5 }
  0x50   : > { %601 = vmatpush.xpose.msk.msra.mxu0 %vm314_vm0, %v312_v0  ;;  %v313_v10 = vld [vmem:[#allocation7] sm:$0xff]  ;;  %s310_s7 = scalar_lea.vmem [#allocation9], %s1113_s8  ;;  %s432_s9 = sshll.u32 %s428_s29, 4  ;;  %s433_s9 = int_to_ptr.hbm [resolvable:$true] %s432_s9 }
  0x51   : > { %386 = vmatpush.msra.mxu1 %v313_v10  ;;  %s430_s11 = sshll.u32 %s310_s7, 4  ;;  %s398_s10 = scalar_lea.sflag [#allocation10], %s1110_s12  ;;  %s431_s11 = int_to_ptr.vmem [resolvable:$true] %s430_s11 }
  0x52   : > { %s816_s13 = sshra.s32 %s433_s9, 4  ;;  %s822_s24 = scalar_lea.hbm %s1196_s4, 32  ;;  %s817_s13 = int_to_ptr.hbm [resolvable:$true] %s816_s13 }
  0x53   : > { %602 = vmatmul.msk.f32.vlgmr.msra.gmra.mxu0 %vm314_vm0, %v311_v1  ;;  %s818_s14 = scalar_lea.hbm %s817_s13, 8  ;;  %p823_p5 = scmp.lt.s32.totalorder %s817_s13, %s1196_s4 }
  0x54   : > { %p819_p4 = scmp.ne.s32.totalorder %s817_s13, %s818_s14  ;;  %p824_p12 = scmp.lt.s32.totalorder %s822_s24, %s818_s14 }
  0x56   : > { %p820_p8 = pnand %p819_p4, %p1085_p13  ;;  %p825_p7 = por %p824_p12, %p823_p5 }
  0x58   : > { %p821_p3 = pneg %p820_p8 }
  0x5a   : > { %p826_p9 = pnand %p825_p7, %p821_p3 }
  0xd0   : > { %v338_v2 = vpop.f32.mrf.mxu0 }
  0xd1   : > { %v341_v3 = vmul.f32 0.17677669, %v338_v2 }
  0xd3   : > { %v343_v4 = vsel %vm342_vm1, %v341_v3, -inf }
  0xd4   : > { %344 = vmax.xlane.f32.xlu0 %v343_v4 }
 0x147   : > { %v345_v5 = vpop.xlane.xlu0 %344 }
 0x148   : > { %v346_v6 = vsub.f32 %v341_v3, %v345_v5 }
 0x14a   : > { %v347_v7 = vmul.f32 1.442695, %v346_v6 }
 0x14c   : > { %708 = vpow2.f32 %v347_v7 }
 0x152   : > { %v709_v8 = vpop.eup %708 }
 0x153   : > { %v349_v9 = vsel %vm342_vm1, %v709_v8, 0.0 }
 0x154   : > { %350 = vadd.xlane.f32.xlu0 %v349_v9 }
 0x1c7   : > { %v351_v11 = vpop.xlane.xlu0 %350 }
 0x1c8   : > { %710 = vrcp.f32 %v351_v11  ;;  %v363_v15 = vand.u32 2147483648, %v351_v11  ;;  %v361_v17 = vand.u32 2147483647, %v351_v11  ;;  %vm357_vm3 = vweird.f32 %v351_v11 }
 0x1ca   : > { %v364_v19 = vor.u32 1.1754944e-38, %v363_v15  ;;  %vm362_vm5 = vcmp.eq.f32.partialorder %v361_v17, 8.507059e+37 }
 0x1ce   : > { %v711_v12 = vpop.eup %710 }
 0x1cf   : > { %v353_v13 = vmul.f32 %v711_v12, %v351_v11  ;;  %vm358_vm2 = vweird.f32 %v711_v12 }
 0x1d0   : > { %vm359_vm4 = vmor %vm357_vm3, %vm358_vm2 }
 0x1d1   : > { %v354_v14 = vsub.f32 1.0, %v353_v13 }
 0x1d3   : > { %v355_v16 = vmul.f32 %v711_v12, %v354_v14 }
 0x1d5   : > { %v356_v18 = vadd.f32 %v711_v12, %v355_v16 }
 0x1d7   : > { %v360_v20 = vsel %vm359_vm4, %v711_v12, %v356_v18 }
 0x1d8   : > { %v365_v21 = vsel %vm362_vm5, %v364_v19, %v360_v20 }
 0x1d9   : > { %v366_v22 = vmul.f32 %v709_v8, %v365_v21 }
 0x1db   : > { %603 = vmatmul.msk.f32.vlgmr.msra.gmra.mxu1 %vm342_vm1, %v366_v22  ;;  %367 = vst.msk [vmem:[%s310_s7] sm:$0xff] %vm342_vm1, %v366_v22 }
 0x1dc   : > { %829 = shalt.err (!%p826_p9)
}
 0x1dd   : > { %619 = dma.vmem_to_hbm [thread:$0]  (%p1085_p13), %s431_s11, 128, %s433_s9, %s398_s10  }
 0x1de   : > { %s411_s2 = scalar_lea.hbm %s1195_s3, %s1023_s5  ;;  %s303_s26 = scalar_lea.vmem [#allocation8], %s1113_s8 }
 0x1df   : > { %s413_s27 = sshll.u32 %s303_s26, 4  ;;  %s415_s29 = sshll.u32 %s411_s2, 4  ;;  %s414_s27 = int_to_ptr.vmem [resolvable:$true] %s413_s27  ;;  %s416_s29 = int_to_ptr.hbm [resolvable:$true] %s415_s29 }
 0x1e0   : > { %s393_s7 = scalar_lea.sflag [#allocation4], %s1110_s12  ;;  %s844_s13 = sshra.s32 %s416_s29, 4  ;;  %s845_s13 = int_to_ptr.hbm [resolvable:$true] %s844_s13 }
 0x1e1   : > { %s846_s14 = scalar_lea.hbm %s845_s13, 8  ;;  %s850_s5 = scalar_lea.hbm %s1195_s3, 32 }
 0x1e2   : > { %p847_p11 = scmp.ne.s32.totalorder %s845_s13, %s846_s14  ;;  %p851_p1 = scmp.lt.s32.totalorder %s845_s13, %s1195_s3 }
 0x1e3   : > { %p852_p2 = scmp.lt.s32.totalorder %s850_s5, %s846_s14 }
 0x1e4   : > { %p848_p10 = pnand %p847_p11, %p1085_p13 }
 0x1e5   : > { %p853_p4 = por %p852_p2, %p851_p1 }
 0x1e6   : > { %p849_p0 = pneg %p848_p10 }
 0x1e8   : > { %p854_p8 = pnand %p853_p4, %p849_p0 }
 0x258   : > { %v388_v23 = vpop.f32.mrf.mxu1 }
 0x259   : > { %391 = vst.msk [vmem:[%s303_s26] sm:$0xff] %vm314_vm0, %v388_v23 }
 0x25a   : > { %857 = shalt.err (!%p854_p8)
}
 0x25b   : > { %618 = dma.vmem_to_hbm [thread:$0]  (%p1085_p13), %s414_s27, 128, %s416_s29, %s393_s7  }
 0x25c PF: > { %p641_p3 = scmp.ge.s32.totalorder %s936_s22, 2  ;;  %s444_s18 = sand.u32 1, %s908_s15  }
 0x25d   : > { %s445_s23 = scalar_lea.sflag [#allocation4], %s444_s18 }
 0x25e   : > { %p634_p5 = pnand %p641_p3, %p1014_p6 }
 0x260   : > { %p635_p12 = pneg %p634_p5 }
 0x262   : > { %899 = dma.done.wait (%p635_p12), %s445_s23, 128  }
 0x263   : > { %901 = vsyncadd (%p635_p12), %s445_s23, 4294967168  ;;  %s455_s24 = scalar_lea.sflag [#allocation10], %s444_s18 }
 0x264   : > { %903 = dma.done.wait (%p635_p12), %s455_s24, 128  }
 0x265   : > { %905 = vsyncadd (%p635_p12), %s455_s24, 4294967168  ;;  %s25_s22 = sadd.s32 1, %s936_s22   ;;  %s1215_s28 = sld [smem:[#allocation16_spill]] }
 0x266   : > { %p22_p7 = scmp.ge.s32.totalorder %s25_s22, 6   ;;  %s1216_s30 = sld [smem:[#allocation17_spill]] }
 0x267   : > { %s1217_s15 = smov %s912_s16  ;;  %s1218_s16 = smov %s916_s17 }
 0x268   : > { %s1219_s17 = smov %s1098_s6  ;;  %s1220_s18 = smov %s928_s20 }
 0x269   : > { %s1221_s19 = smov %s932_s21  ;;  %24 = sbr.rel (!%p22_p7) target bundleno = 13 (0xd), region = 104 }
 0x26b   : > { %s1222_s20 = smov %s1215_s28 }
 0x26c   : > { %s1223_s21 = smov %s1216_s30 }
 0x26e   :  { %461 = vsyncpa [#allocation3], 1 }
 0x26f   :  { %463 = vsyncpa [#allocation3 + $0x1], 1 }
 0x270   :  { %464 = vsyncpa [#allocation6], 1 }
 0x271   :  { %465 = vsyncpa [#allocation4], 1 }
 0x272   :  { %467 = vsyncpa [#allocation4 + $0x1], 1 }
 0x273   :  { %468 = vsyncpa [#allocation10], 1 }
 0x274   :  { %470 = vsyncpa [#allocation10 + $0x1], 1 }

// kernel: tpu_custom_call.1
= control target key start
LH: loop header
LB: loop body
LE: loop exit
PB: predicated region body
PF: predicated region fallthrough
CT: control target
= control target key end

     0   :  { %s1221_s0 = inlined_call_operand.hbm [shape: f32[2,2,8,32], index: 0, kind: input, shape index: {}]   ;;  %s1222_s1 = inlined_call_operand.hbm [shape: f32[2,2,8,32], index: 1, kind: input, shape index: {}]   ;;  %s1223_s2 = inlined_call_operand.hbm [shape: f32[2,2,8,32], index: 2, kind: input, shape index: {}]   ;;  %s1224_s3 = inlined_call_operand.hbm [shape: f32[2,2,8,32], index: 3, kind: output, shape index: {0}]   ;;  %s1225_s4 = inlined_call_operand.hbm [shape: f32[2,2,8,8], index: 4, kind: output, shape index: {1}]  }
   0x1   :  { %1232 = sst [smem:[#allocation22_spill]] %s1222_s1 }
   0x2   :  { %10 = vsyncpa [#allocation3], 0 }
   0x3   :  { %12 = vsyncpa [#allocation3 + $0x1], 0 }
   0x4   :  { %13 = vsyncpa [#allocation6], 0 }
   0x5   :  { %15 = vsyncpa [#allocation6 + $0x1], 0 }
   0x6   :  { %16 = vsyncpa [#allocation4], 0 }
   0x7   :  { %18 = vsyncpa [#allocation4 + $0x1], 0 }
   0x8   :  { %19 = vsyncpa [#allocation10], 0 }
   0x9   :  { %21 = vsyncpa [#allocation10 + $0x1], 0  ;;  %s1016_s15 = smov 0   ;;  %s1018_s16 = smov 0  }
   0xa   :  { %s1020_s17 = smov 0   ;;  %s1022_s18 = smov 0  }
   0xb   :  { %s1024_s19 = smov 0   ;;  %s1026_s20 = smov 0  }
   0xc   :  { %s1028_s21 = smov 0   ;;  %s1030_s22 = smov 0  }
   0xd LB: > { %1233 = sst [smem:[#allocation15_spill]] %s969_s17  ;;  %s1057_s23 = sadd.s32 4294967295, %s989_s22   ;;  %s989_s22 = sphi %s1030_s22, %s27_s22   ;;  %s985_s21 = sphi %s1028_s21, %s1253_s21   ;;  %s981_s20 = sphi %s1026_s20, %s1252_s20   ;;  %s977_s19 = sphi %s1024_s19, %s1251_s19   ;;  %s973_s18 = sphi %s1022_s18, %s1250_s18   ;;  %s969_s17 = sphi %s1020_s17, %s1249_s17   ;;  %s965_s16 = sphi %s1018_s16, %s1255_s16   ;;  %s961_s15 = sphi %s1016_s15, %s1254_s15  }
   0xe   : > { %1234 = sst [smem:[#allocation16_spill]] %s981_s20  ;;  %s639_s24 = sadd.s32 4294967294, %s989_s22  }
   0xf   : > { %1235 = sst [smem:[#allocation17_spill]] %s985_s21  ;;  %s42_s25 = sadd.s32 1, %s981_s20 }
  0x10   : > { %s46_s26 = sadd.s32 1, %s985_s21  ;;  %p44_p0 = scmp.ge.s32.totalorder %s42_s25, 2 }
  0x11   : > { %s57_s27 = sadd.s32 1, %s969_s17  ;;  %p64_p1 = scmp.ne.s32.totalorder %s969_s17, %s965_s16 }
  0x12   : > { %p65_p2 = scmp.eq.s32.totalorder %s989_s22, 0  ;;  %s1257_s25 = smov (%p44_p0, %s42_s25), 0 }
  0x13   : > { %1236 = sst [smem:[#allocation18_spill]] %s1257_s25  ;;  %s1259_s26 = smov (!%p44_p0, %s46_s26), %s985_s21 }
  0x14   : > { %s51_s28 = ssub.s32 %s981_s20, %s1257_s25  ;;  %p1071_p3 = por %p65_p2, %p64_p1 }
  0x15   : > { %p48_p4 = scmp.ge.s32.totalorder %s1259_s26, 2  ;;  %p70_p5 = scmp.ne.s32.totalorder %s965_s16, %s961_s15 }
  0x16   : > { %p71_p6 = scmp.eq.s32.totalorder %s1057_s23, 0  ;;  %p154_p7 = scmp.eq.s32.totalorder %s1057_s23, 3 }
  0x17   : > { %s1261_s26 = smov (%p48_p4, %s1259_s26), 0  ;;  %p160_p10 = scmp.eq.s32.totalorder %s639_s24, 3 }
  0x18   : > { %1238 = sst [smem:[#allocation19_spill]] %s1261_s26  ;;  %p1081_p8 = por %p71_p6, %p70_p5 }
  0x19   : > { %p1085_p9 = por %p154_p7, %p64_p1  ;;  %s50_s6 = ssub.s32 %s985_s21, %s1261_s26 }
  0x1a   : > { %s52_s7 = sor.u32 %s51_s28, %s50_s6  ;;  %p1091_p12 = por %p160_p10, %p70_p5 }
  0x1b   : > { %p55_p11 = scmp.eq.s32.totalorder %s52_s7, 0  ;;  %p695_p13 = scmp.lt.s32.totalorder %s989_s22, 4 }
  0x1c   : > { %s1241_s8 = scalar_select %p1091_p12, 1, 0 }
  0x1d   : > { %s210_s9 = sand.u32 1, %s969_s17   ;;  %s643_s12 = sshll.u32 %s985_s21, 1 }
  0x1e   : > { %1242 = sst [smem:[#allocation20_spill]] %s1241_s8  ;;  %s642_s11 = sshll.u32 %s210_s9, 3 }
  0x1f   : > { %s1098_s10 = scalar_select %p55_p11, %s969_s17, %s57_s27  }
  0x20   : > { %s219_s13 = sadd.s32 %s981_s20, %s643_s12  ;;  %p1104_p0 = pnand %p695_p13, %p1071_p3 }
  0x21   : > { %1243 = sst [smem:[#allocation21_spill]] %s1098_s10  ;;  %s644_s24 = sshll.u32 %s219_s13, 3 }
  0x22   : > { %s232_s28 = sand.u32 1, %s989_s22   ;;  %s1245_s1 = sld [smem:[#allocation22_spill]] }
  0x23   : > { %s236_s8 = scalar_lea.vmem [#allocation5], %s642_s11  ;;  %s233_s21 = scalar_lea.sflag [#allocation6], %s232_s28 }
  0x24   : > { %s246_s27 = sshll.u32 %s236_s8, 4  ;;  %p651_p1 = scmp.ge.s32.totalorder %s989_s22, 1  ;;  %s247_s27 = int_to_ptr.vmem [resolvable:$true] %s246_s27 }
  0x25   : > { %p272_p2 = scmp.lt.s32.totalorder %s989_s22, 5  ;;  %s221_s6 = scalar_lea.hbm %s1221_s0, %s644_s24 }
  0x26   : > { %s214_s7 = scalar_lea.vmem [#allocation2], %s642_s11  ;;  %s211_s8 = scalar_lea.sflag [#allocation3], %s210_s9 }
  0x27   : > { %p1116_p3 = pnand %p651_p1, %p272_p2  ;;  %s257_s10 = scalar_lea.vmem [#allocation7], %s642_s11 }
  0x28   : > { %s242_s26 = scalar_lea.hbm %s1245_s1, %s644_s24  ;;  %s225_s1 = sshll.u32 %s214_s7, 4  ;;  %s226_s1 = int_to_ptr.vmem [resolvable:$true] %s225_s1 }
  0x29   : > { %s244_s25 = sshll.u32 %s242_s26, 4  ;;  %s223_s26 = sshll.u32 %s221_s6, 4  ;;  %s245_s25 = int_to_ptr.hbm [resolvable:$true] %s244_s25  ;;  %s224_s26 = int_to_ptr.hbm [resolvable:$true] %s223_s26 }
  0x2a   : > { %684 = dma.hbm_to_vmem [thread:$0]  (!%p1104_p0), %s245_s25, 128, %s247_s27, %s233_s21  }
  0x2b   : > { %681 = dma.hbm_to_vmem [thread:$0]  (!%p1104_p0), %s224_s26, 128, %s226_s1, %s211_s8  }
  0x2c   : > { %s263_s27 = scalar_lea.hbm %s1223_s2, %s644_s24  ;;  %s267_s17 = sshll.u32 %s257_s10, 4  ;;  %s268_s17 = int_to_ptr.vmem [resolvable:$true] %s267_s17 }
  0x2d   : > { %s265_s20 = sshll.u32 %s263_s27, 4  ;;  %276 = sbr.rel (%p1116_p3) target bundleno = 579 (0x243), region = 32  ;;  %s266_s20 = int_to_ptr.hbm [resolvable:$true] %s265_s20 }
  0x2e   : > { %687 = dma.hbm_to_vmem [thread:$0]  (!%p1104_p0), %s266_s20, 128, %s268_s17, %s233_s21  }
  0x2f   : > { %s1133_s12 = sand.u32 (!%p1116_p3), 1, %s965_s16  }
  0x30   : > { %s1136_s1 = sshll.u32 (!%p1116_p3), %s1133_s12, 3  ;;  %s279_s9 = scalar_lea.sflag (!%p1116_p3), [#allocation3], %s1133_s12 }
  0x31   : > { %s282_s24 = scalar_lea.vmem (!%p1116_p3), [#allocation2], %s1136_s1 }
  0x32   : > { %944 = dma.done.wait (%p1081_p8), %s279_s9, 128  }
  0x33   : > { %946 = vsyncadd (%p1081_p8), %s279_s9, 4294967168  ;;  %s288_s17 = sand.u32 1, %s1057_s23   ;;  %s292_s21 = scalar_lea.vmem [#allocation5], %s1136_s1 }
  0x34   : > { %s289_s20 = scalar_lea.sflag [#allocation6], %s288_s17 }
  0x35   : > { %948 = dma.done.wait (%p1081_p8), %s289_s20, 256  }
  0x36   : > { %950 = vsyncadd (%p1081_p8), %s289_s20, 4294967040  ;;  %vm346_vm0 = vcmask 261120   ;;  %v344_v0 = vld [vmem:[%s292_s21] sm:$0xff]  ;;  %v343_v1 = vld [vmem:[%s282_s24] sm:$0xff]  ;;  %vm374_vm1 = vcmask 64512   ;;  %s302_s23 = scalar_lea.vmem [#allocation7], %s1136_s1 }
  0x37   : > { %657 = vmatpush.xpose.msk.msra.mxu0 %vm346_vm0, %v344_v0  ;;  %v345_v10 = vld [vmem:[%s302_s23] sm:$0xff]  ;;  %s662_s30 = sshll.u32 %s977_s19, 1  ;;  %s342_s19 = scalar_lea.vmem [#allocation9], %s1136_s1 }
  0x38   : > { %418 = vmatpush.msra.mxu1 %v345_v10  ;;  %s1157_s10 = sadd.s32 %s973_s18, %s662_s30  ;;  %s462_s18 = sshll.u32 %s342_s19, 4  ;;  %s463_s18 = int_to_ptr.vmem [resolvable:$true] %s462_s18 }
  0x39   : > { %s663_s11 = sshll.u32 %s1157_s10, 3  ;;  %s430_s26 = scalar_lea.sflag [#allocation10], %s1133_s12 }
  0x3a   : > { %658 = vmatmul.msk.f32.vlgmr.msra.gmra.mxu0 %vm346_vm0, %v343_v1  ;;  %s460_s13 = scalar_lea.hbm %s1225_s4, %s663_s11  ;;  %s875_s27 = scalar_lea.hbm %s1225_s4, 32 }
  0x3b   : > { %s464_s6 = sshll.u32 %s460_s13, 4  ;;  %s465_s6 = int_to_ptr.hbm [resolvable:$true] %s464_s6 }
  0x3c   : > { %s869_s7 = sshra.s32 %s465_s6, 4  ;;  %s870_s7 = int_to_ptr.hbm [resolvable:$true] %s869_s7 }
  0x3d   : > { %s871_s8 = scalar_lea.hbm %s870_s7, 8  ;;  %p876_p7 = scmp.lt.s32.totalorder %s870_s7, %s1225_s4 }
  0x3e   : > { %p872_p4 = scmp.ne.s32.totalorder %s870_s7, %s871_s8  ;;  %p877_p8 = scmp.lt.s32.totalorder %s875_s27, %s871_s8 }
  0x40   : > { %p873_p5 = pnand %p872_p4, %p1085_p9  ;;  %p878_p10 = por %p877_p8, %p876_p7 }
  0x42   : > { %p874_p6 = pneg %p873_p5 }
  0x44   : > { %p879_p11 = pnand %p878_p10, %p874_p6 }
  0xb7   : > { %v370_v2 = vpop.f32.mrf.mxu0 }
  0xb8   : > { %v373_v3 = vmul.f32 0.17677669, %v370_v2 }
  0xba   : > { %v375_v4 = vsel %vm374_vm1, %v373_v3, -inf }
  0xbb   : > { %376 = vmax.xlane.f32.xlu0 %v375_v4 }
 0x12e   : > { %v377_v5 = vpop.xlane.xlu0 %376 }
 0x12f   : > { %v378_v6 = vsub.f32 %v373_v3, %v377_v5 }
 0x131   : > { %v379_v7 = vmul.f32 1.442695, %v378_v6 }
 0x133   : > { %761 = vpow2.f32 %v379_v7 }
 0x139   : > { %v762_v8 = vpop.eup %761 }
 0x13a   : > { %v381_v9 = vsel %vm374_vm1, %v762_v8, 0.0 }
 0x13b   : > { %382 = vadd.xlane.f32.xlu0 %v381_v9 }
 0x1ae   : > { %v383_v11 = vpop.xlane.xlu0 %382 }
 0x1af   : > { %763 = vrcp.f32 %v383_v11  ;;  %v395_v15 = vand.u32 2147483648, %v383_v11  ;;  %v393_v17 = vand.u32 2147483647, %v383_v11  ;;  %vm389_vm3 = vweird.f32 %v383_v11 }
 0x1b1   : > { %v396_v19 = vor.u32 1.1754944e-38, %v395_v15  ;;  %vm394_vm5 = vcmp.eq.f32.partialorder %v393_v17, 8.507059e+37 }
 0x1b5   : > { %v764_v12 = vpop.eup %763 }
 0x1b6   : > { %v385_v13 = vmul.f32 %v764_v12, %v383_v11  ;;  %vm390_vm2 = vweird.f32 %v764_v12 }
 0x1b7   : > { %vm391_vm4 = vmor %vm389_vm3, %vm390_vm2 }
 0x1b8   : > { %v386_v14 = vsub.f32 1.0, %v385_v13 }
 0x1ba   : > { %v387_v16 = vmul.f32 %v764_v12, %v386_v14 }
 0x1bc   : > { %v388_v18 = vadd.f32 %v764_v12, %v387_v16 }
 0x1be   : > { %v392_v20 = vsel %vm391_vm4, %v764_v12, %v388_v18 }
 0x1bf   : > { %v397_v21 = vsel %vm394_vm5, %v396_v19, %v392_v20 }
 0x1c0   : > { %v398_v22 = vmul.f32 %v762_v8, %v397_v21 }
 0x1c2   : > { %659 = vmatmul.msk.f32.vlgmr.msra.gmra.mxu1 %vm374_vm1, %v398_v22  ;;  %399 = vst.msk [vmem:[%s342_s19] sm:$0xff] %vm374_vm1, %v398_v22 }
 0x1c3   : > { %882 = shalt.err (!%p879_p11)
}
 0x1c4   : > { %675 = dma.vmem_to_hbm [thread:$0]  (%p1085_p9), %s463_s18, 128, %s465_s6, %s430_s26  }
 0x1c5   : > { %s443_s21 = scalar_lea.hbm %s1224_s3, %s663_s11  ;;  %s335_s23 = scalar_lea.vmem [#allocation8], %s1136_s1 }
 0x1c6   : > { %s445_s30 = sshll.u32 %s335_s23, 4  ;;  %s447_s10 = sshll.u32 %s443_s21, 4  ;;  %s446_s30 = int_to_ptr.vmem [resolvable:$true] %s445_s30  ;;  %s448_s10 = int_to_ptr.hbm [resolvable:$true] %s447_s10 }
 0x1c7   : > { %s425_s14 = scalar_lea.sflag [#allocation4], %s1133_s12  ;;  %s897_s29 = sshra.s32 %s448_s10, 4  ;;  %s898_s29 = int_to_ptr.hbm [resolvable:$true] %s897_s29 }
 0x1c8   : > { %s899_s13 = scalar_lea.hbm %s898_s29, 8  ;;  %s903_s11 = scalar_lea.hbm %s1224_s3, 32 }
 0x1c9   : > { %p900_p13 = scmp.ne.s32.totalorder %s898_s29, %s899_s13  ;;  %p904_p2 = scmp.lt.s32.totalorder %s898_s29, %s1224_s3 }
 0x1ca   : > { %p905_p3 = scmp.lt.s32.totalorder %s903_s11, %s899_s13 }
 0x1cb   : > { %p901_p0 = pnand %p900_p13, %p1085_p9 }
 0x1cc   : > { %p906_p4 = por %p905_p3, %p904_p2 }
 0x1cd   : > { %p902_p1 = pneg %p901_p0 }
 0x1cf   : > { %p907_p5 = pnand %p906_p4, %p902_p1 }
 0x23f   : > { %v420_v23 = vpop.f32.mrf.mxu1 }
 0x240   : > { %423 = vst.msk [vmem:[%s335_s23] sm:$0xff] %vm346_vm0, %v420_v23 }
 0x241   : > { %910 = shalt.err (!%p907_p5)
}
 0x242   : > { %674 = dma.vmem_to_hbm [thread:$0]  (%p1085_p9), %s446_s30, 128, %s448_s10, %s425_s14  }
 0x243 PF: > { %p696_p6 = scmp.ge.s32.totalorder %s989_s22, 2  ;;  %s476_s26 = sand.u32 1, %s961_s15  }
 0x244   : > { %s477_s7 = scalar_lea.sflag [#allocation4], %s476_s26 }
 0x245   : > { %p689_p7 = pnand %p696_p6, %p1091_p12 }
 0x247   : > { %p690_p8 = pneg %p689_p7 }
 0x249   : > { %952 = dma.done.wait (%p690_p8), %s477_s7, 128  }
 0x24a   : > { %954 = vsyncadd (%p690_p8), %s477_s7, 4294967168  ;;  %s487_s8 = scalar_lea.sflag [#allocation10], %s476_s26 }
 0x24b   : > { %956 = dma.done.wait (%p690_p8), %s487_s8, 128  }
 0x24c   : > { %958 = vsyncadd (%p690_p8), %s487_s8, 4294967168  ;;  %s27_s22 = sadd.s32 1, %s989_s22   ;;  %s1248_s5 = sld [smem:[#allocation15_spill]] }
 0x24d   : > { %p24_p10 = scmp.ge.s32.totalorder %s27_s22, 6   ;;  %s1249_s17 = sld [smem:[#allocation21_spill]] }
 0x24e   : > { %s1250_s18 = sld [smem:[#allocation16_spill]]  ;;  %s1254_s15 = smov %s965_s16 }
 0x24f   : > { %s1251_s19 = sld [smem:[#allocation17_spill]]  ;;  %26 = sbr.rel (!%p24_p10) target bundleno = 13 (0xd), region = 118 }
 0x250   : > { %s1252_s20 = sld [smem:[#allocation18_spill]] }
 0x251   : > { %s1253_s21 = sld [smem:[#allocation19_spill]] }
 0x252   : > { %s1255_s16 = smov %s1248_s5 }
 0x254   :  { %493 = vsyncpa [#allocation3], 1 }
 0x255   :  { %495 = vsyncpa [#allocation3 + $0x1], 1 }
 0x256   :  { %496 = vsyncpa [#allocation6], 1 }
 0x257   :  { %498 = vsyncpa [#allocation6 + $0x1], 1 }
 0x258   :  { %499 = vsyncpa [#allocation4], 1 }
 0x259   :  { %501 = vsyncpa [#allocation4 + $0x1], 1 }
 0x25a   :  { %502 = vsyncpa [#allocation10], 1 }
 0x25b   :  { %504 = vsyncpa [#allocation10 + $0x1], 1 }

</bundles_post_ra>
